<compile_context>
chip_gen: v5e
topology: v5e:2x2
jax: 0.10.0
libtpu: 0.0.40
codegen_flags: <defaults>
</compile_context>

<pallas_src>
import math

import jax
import jax.numpy as jnp
from jax.experimental import pallas as pl
from jax.experimental.pallas import tpu as pltpu


def _build_pe(d_model: int, max_seq_length: int = 5000) -> jnp.ndarray:
    """Deterministic buffer construction, identical math to the PyTorch __init__."""
    position = jnp.arange(max_seq_length, dtype=jnp.float32)[:, None]          # (L, 1)
    div_term = jnp.exp(
        jnp.arange(0, d_model, 2, dtype=jnp.float32) * (-math.log(10000.0) / d_model)
    )                                                                           # (ceil(D/2),)
    angles = position * div_term                                                # (L, ceil(D/2))
    pe = jnp.zeros((max_seq_length, d_model), dtype=jnp.float32)
    pe = pe.at[:, 0::2].set(jnp.sin(angles))
    pe = pe.at[:, 1::2].set(jnp.cos(angles[:, : d_model // 2]))                 # odd D safe
    return pe[:, None, :]                                                       # (L, 1, D)


def _round_up(x: int, m: int) -> int:
    return (x + m - 1) // m * m


def _choose_seq_tile(S: int, B: int, D: int, itemsize: int,
                     vmem_budget_bytes: int = 8 * 1024 * 1024) -> int:
    """Largest multiple-of-8 sequence tile whose double-buffered x/out/pe tiles
    fit the VMEM budget ((8,128)-padding included), capped to keep >=2 grid
    steps for the two v7x TensorCores when S permits."""
    xo_row = _round_up(B, 8) * _round_up(D, 128) * itemsize   # x tile row / out tile row
    pe_row = 8 * _round_up(D, 128) * 4                        # (tile,1,D) f32 pe tile row
    row_bytes = 2 * (2 * xo_row + pe_row)                     # x2 for double buffering
    tile = max(8, (vmem_budget_bytes // row_bytes) // 8 * 8)
    if S >= 16:
        tile = min(tile, max(8, _round_up(pl.cdiv(S, 2), 8)))  # grid >= 2 (v7x megacore)
    tile = min(tile, _round_up(S, 8))
    return tile


def _pe_add_kernel(x_ref, pe_ref, o_ref):
    # x_ref/o_ref: (tile, B, D);  pe_ref: (tile, 1, D) -- broadcast over batch.
    x = x_ref[...].astype(jnp.float32)
    o_ref[...] = (x + pe_ref[...]).astype(o_ref.dtype)


@jax.jit
def positional_encoding_forward(x: jnp.ndarray, pe: jnp.ndarray) -> jnp.ndarray:
    """x: (S, B, D);  pe: (max_seq, 1, D) f32;  returns x + pe[:S] in x.dtype."""
    S, B, D = x.shape
    seq_tile = _choose_seq_tile(S, B, D, jnp.dtype(x.dtype).itemsize)
    grid = (pl.cdiv(S, seq_tile),)

    return pl.pallas_call(
        _pe_add_kernel,
        out_shape=jax.ShapeDtypeStruct((S, B, D), x.dtype),
        grid_spec=pl.GridSpec(
            grid=grid,
            in_specs=[
                # x tiled along the sequence axis; (B, D) trailing dims full-extent.
                pl.BlockSpec((seq_tile, B, D), lambda i: (i, 0, 0)),
                # Only the first ceil(S/tile) blocks of the (5000, 1, D) buffer
                # are ever DMA'd from HBM.
                pl.BlockSpec((seq_tile, 1, D), lambda i: (i, 0, 0)),
            ],
            out_specs=pl.BlockSpec((seq_tile, B, D), lambda i: (i, 0, 0)),
        ),
        # In-place update: output aliases x (elementwise, each block read before write).
        input_output_aliases={0: 0},
        compiler_params=pltpu.CompilerParams(dimension_semantics=("parallel",)),
    )(x, pe)


if __name__ == "__main__":
    # Small shapes consistent with the module (seq-first transformer input).
    S, B, D = 32, 2, 32
    max_seq_length = 5000

    key = jax.random.PRNGKey(0)
    x = jax.random.normal(key, (S, B, D), dtype=jnp.float32)
    pe = _build_pe(D, max_seq_length)

    # Reference computed before the kernel call (output may alias x's buffer).
    ref = x + pe[:S]

    out = jax.block_until_ready(positional_encoding_forward(x, pe))

    assert out.shape == (S, B, D)
    assert out.dtype == x.dtype
    assert jnp.allclose(out, ref, atol=1e-6, rtol=1e-6)

    print("KERNEL_OK")
</pallas_src>

<mosaic_0001>
module attributes {stable_mosaic.version = 11 : i64} {
  func.func @_pe_add_kernel(%arg0: i32, %arg1: memref<16x2x32xf32, #tpu.memory_space<vmem>>, %arg2: memref<16x1x32xf32, #tpu.memory_space<vmem>>, %arg3: memref<16x2x32xf32, #tpu.memory_space<vmem>>) attributes {dimension_semantics = [#tpu.dimension_semantics<parallel>], iteration_bounds = array<i64: 2>, scalar_prefetch = 0 : i64, scratch_operands = 0 : i64, tpu.core_type = #tpu.core_type<tc>, window_params = [{transform_indices = @transform_0, window_bounds = array<i64: 16, 2, 32>}, {transform_indices = @transform_1, window_bounds = array<i64: 16, 1, 32>}, {transform_indices = @transform_2, window_bounds = array<i64: 16, 2, 32>}]} {
    %c0 = arith.constant 0 : index
    %c0_0 = arith.constant 0 : index
    %c0_1 = arith.constant 0 : index
    %0 = vector.load %arg1[%c0, %c0_0, %c0_1] : memref<16x2x32xf32, #tpu.memory_space<vmem>>, vector<16x2x32xf32>
    %c0_2 = arith.constant 0 : index
    %c0_3 = arith.constant 0 : index
    %c0_4 = arith.constant 0 : index
    %1 = vector.load %arg2[%c0_2, %c0_3, %c0_4] : memref<16x1x32xf32, #tpu.memory_space<vmem>>, vector<16x1x32xf32>
    %2 = vector.broadcast %1 : vector<16x1x32xf32> to vector<16x2x32xf32>
    %3 = arith.addf %0, %2 : vector<16x2x32xf32>
    %c0_5 = arith.constant 0 : index
    %c0_6 = arith.constant 0 : index
    %c0_7 = arith.constant 0 : index
    %4 = vector.load %arg3[%c0_5, %c0_6, %c0_7] : memref<16x2x32xf32, #tpu.memory_space<vmem>>, vector<16x2x32xf32>
    tpu.vector_store %arg3[%c0_5, %c0_6, %c0_7], %3 {strides = array<i32>} : memref<16x2x32xf32, #tpu.memory_space<vmem>>, vector<16x2x32xf32>,
    return
  }
  func.func @transform_0(%arg0: i32) -> (i32, i32, i32) {
    %c0_i32 = arith.constant 0 : i32
    %c0_i32_0 = arith.constant 0 : i32
    %c0_i32_1 = arith.constant 0 : i32
    return %arg0, %c0_i32, %c0_i32_0 : i32, i32, i32
  }
  func.func @transform_1(%arg0: i32) -> (i32, i32, i32) {
    %c0_i32 = arith.constant 0 : i32
    %c0_i32_0 = arith.constant 0 : i32
    %c0_i32_1 = arith.constant 0 : i32
    return %arg0, %c0_i32, %c0_i32_0 : i32, i32, i32
  }
  func.func @transform_2(%arg0: i32) -> (i32, i32, i32) {
    %c0_i32 = arith.constant 0 : i32
    %c0_i32_0 = arith.constant 0 : i32
    %c0_i32_1 = arith.constant 0 : i32
    return %arg0, %c0_i32, %c0_i32_0 : i32, i32, i32
  }
}

</mosaic_0001>

<bundles_post_ra>
// kernel: positional_encoding_forward.1
= control target key start
LH: loop header
LB: loop body
LE: loop exit
PB: predicated region body
PF: predicated region fallthrough
CT: control target
= control target key end

     0   :  { %7 = vsyncpa [#allocation3], 0  ;;  %s820_s0 = inlined_call_operand.hbm [shape: f32[32,2,32], index: 0, kind: input, shape index: {}, may-alias: {0,2}]   ;;  %s821_s1 = inlined_call_operand.vmem [shape: f32[5000,1,32], index: 1, kind: input, shape index: {}]   ;;  %s822_s2 = inlined_call_operand.hbm [shape: f32[32,2,32], index: 2, kind: output, shape index: {}, may-alias: {0,2}]  }
   0x1   :  { %9 = vsyncpa [#allocation3 + $0x1], 0 }
   0x2   :  { %10 = vsyncpa [#allocation4], 0 }
   0x3   :  { %12 = vsyncpa [#allocation4 + $0x1], 0  ;;  %s611_s9 = smov 0   ;;  %s613_s10 = smov 0  }
   0x4   :  { %s615_s11 = smov 0   ;;  %s617_s12 = smov 0  }
   0x5 LB: > { %s632_s13 = sadd.s32 4294967295, %s590_s12   ;;  %s411_s14 = sadd.s32 4294967294, %s590_s12   ;;  %s590_s12 = sphi %s617_s12, %s832_s12   ;;  %s586_s11 = sphi %s615_s11, %s831_s11   ;;  %s582_s10 = sphi %s613_s10, %s830_s10   ;;  %s578_s9 = sphi %s611_s9, %s829_s9  }
   0x6   : > { %s636_s15 = sadd.s32 1, %s590_s12   ;;  %s25_s16 = sadd.s32 1, %s586_s11 }
   0x7   : > { %s22_s17 = ssub.s32 %s590_s12, %s636_s15  ;;  %p32_p0 = scmp.ne.s32.totalorder %s586_s11, %s582_s10 }
   0x8   : > { %p23_p1 = scmp.eq.s32.totalorder %s22_s17, 0  ;;  %p33_p2 = scmp.eq.s32.totalorder %s590_s12, 0 }
   0x9   : > { %p38_p3 = scmp.ne.s32.totalorder %s582_s10, %s578_s9  ;;  %p39_p4 = scmp.eq.s32.totalorder %s632_s13, 0 }
   0xa   : > { %s648_s18 = scalar_select %p23_p1, %s586_s11, %s25_s16  }
   0xb   : > { %p650_p5 = por %p33_p2, %p32_p0  ;;  %p654_p6 = por %p39_p4, %p38_p3 }
   0xc   : > { %p88_p7 = scmp.eq.s32.totalorder %s632_s13, 1  ;;  %p94_p8 = scmp.eq.s32.totalorder %s411_s14, 1 }
   0xd   : > { %p440_p10 = scmp.lt.s32.totalorder %s590_s12, 2  ;;  %s114_s23 = sand.u32 1, %s586_s11  }
   0xe   : > { %p661_p11 = por %p88_p7, %p32_p0  ;;  %p665_p12 = por %p94_p8, %p38_p3 }
   0xf   : > { %s426_s24 = sshll.u32 %s590_s12, 5  ;;  %s414_s25 = sshll.u32 %s114_s23, 5 }
  0x10   : > { %s123_s28 = scalar_lea.hbm %s820_s0, %s426_s24  ;;  %s118_s30 = scalar_lea.vmem [#allocation2], %s414_s25 }
  0x11   : > { %s124_s29 = sshll.u32 %s123_s28, 4  ;;  %s126_s3 = sshll.u32 %s118_s30, 4  ;;  %s125_s29 = int_to_ptr.hbm [resolvable:$true] %s124_s29  ;;  %s127_s3 = int_to_ptr.vmem [resolvable:$true] %s126_s3 }
  0x12   : > { %p676_p13 = pnand %p440_p10, %p650_p5  ;;  %p417_p0 = scmp.ge.s32.totalorder %s590_s12, 1 }
  0x13   : > { %p148_p1 = scmp.lt.s32.totalorder %s590_s12, 3  ;;  %s115_s5 = scalar_lea.sflag [#allocation3], %s114_s23 }
  0x14   : > { %s494_s6 = sshra.s32 %s125_s29, 4  ;;  %p498_p3 = pneg %p676_p13  ;;  %s495_s6 = int_to_ptr.hbm [resolvable:$true] %s494_s6 }
  0x15   : > { %s496_s7 = scalar_lea.hbm %s495_s6, 32  ;;  %s501_s16 = scalar_lea.hbm %s820_s0, 64 }
  0x16   : > { %p497_p2 = scmp.ne.s32.totalorder %s495_s6, %s496_s7  ;;  %p502_p5 = scmp.lt.s32.totalorder %s495_s6, %s820_s0 }
  0x17   : > { %p503_p8 = scmp.lt.s32.totalorder %s501_s16, %s496_s7 }
  0x18   : > { %p499_p4 = pnand %p498_p3, %p497_p2 }
  0x19   : > { %p504_p10 = por %p503_p8, %p502_p5 }
  0x1a   : > { %p500_p7 = pneg %p499_p4 }
  0x1c   : > { %p505_p9 = pnand %p504_p10, %p500_p7 }
  0x1e   : > { %508 = shalt.err (!%p505_p9)
}
  0x1f   : > { %s592_s23 = smov 32   ;;  %s593_s24 = smov 2  }
  0x20   : > { %435 = dma.hbm_to_vmem [thread:$0]  (!%p676_p13), %s125_s29, 512, %s127_s3, %s115_s5, %s592_s23, %s592_s23, %s593_s24  }
  0x21   : > { %p149_p2 = pnand %p417_p0, %p148_p1 }
  0x22   : > { %s697_s25 = sand.u32 (!%p149_p2), 1, %s582_s10  }
  0x23   : > { %152 = sbr.rel (%p149_p2) target bundleno = 68 (0x44), region = 28  ;;  %s418_s26 = sshll.u32 (!%p149_p2), %s697_s25, 5 }
  0x24   : > { %s155_s27 = scalar_lea.sflag (!%p149_p2), [#allocation3], %s697_s25  ;;  %s701_s28 = scalar_lea.vmem (!%p149_p2), [#allocation2], %s418_s26 }
  0x28   : > { %569 = dma.done.wait (%p654_p6), %s155_s27, 512  }
  0x29   : > { %571 = vsyncadd (%p654_p6), %s155_s27, 4294966784  ;;  %s420_s29 = sshll.u32 %s632_s13, 4  ;;  %s427_s30 = sshll.u32 %s632_s13, 5  ;;  %vm296_vm0 = vcmask 254976   ;;  %v200_v0 = vld [vmem:[%s701_s28] sm:$0x3] }
  0x2a   : > { %p192_p9 = scmp.lt.s32.totalorder %s420_s29, 4999  ;;  %s712_s5 = scalar_lea.hbm %s822_s2, %s427_s30  ;;  %v201_v2 = vld [vmem:[%s701_s28 + $0x2] sm:$0x3]  ;;  %v202_v5 = vld [vmem:[%s701_s28 + $0x4] sm:$0x3] }
  0x2b   : > { %s719_s13 = scalar_lea.vmem [#allocation5], %s418_s26  ;;  %s328_s14 = sshll.u32 %s712_s5, 4  ;;  %v203_v8 = vld [vmem:[%s701_s28 + $0x6] sm:$0x3]  ;;  %v204_v11 = vld [vmem:[%s701_s28 + $0x8] sm:$0x3]  ;;  %s329_s14 = int_to_ptr.hbm [resolvable:$true] %s328_s14 }
  0x2c   : > { %s834_s29 = smov (!%p192_p9, %s420_s29), 4999  ;;  %s326_s8 = sshll.u32 %s719_s13, 4  ;;  %v205_v14 = vld [vmem:[%s701_s28 + $0xa] sm:$0x3]  ;;  %v206_v17 = vld [vmem:[%s701_s28 + $0xc] sm:$0x3]  ;;  %s327_s8 = int_to_ptr.vmem [resolvable:$true] %s326_s8 }
  0x2d   : > { %s717_s20 = scalar_lea.vmem %s821_s1, %s834_s29  ;;  %v207_v20 = vld [vmem:[%s701_s28 + $0xe] sm:$0x3]  ;;  %v208_v22 = vld [vmem:[%s701_s28 + $0x10] sm:$0x3]  ;;  %v209_v26 = vld [vmem:[%s701_s28 + $0x12] sm:$0x3] }
  0x2e   : > { %v478_v1 = vld [vmem:[%s717_s20] ss:$0 sm:$0xff]  ;;  %v479_v3 = vld [vmem:[%s717_s20 + $0x1] ss:$0 sm:$0xff]  ;;  %v480_v6 = vld [vmem:[%s717_s20 + $0x2] ss:$0 sm:$0xff] }
  0x2f   : > { %v280_v4 = vadd.f32 %v478_v1, %v200_v0  ;;  %v281_v7 = vadd.f32 %v479_v3, %v201_v2  ;;  %v481_v9 = vld [vmem:[%s717_s20 + $0x3] ss:$0 sm:$0xff]  ;;  %v282_v10 = vadd.f32 %v480_v6, %v202_v5  ;;  %v482_v13 = vld [vmem:[%s717_s20 + $0x4] ss:$0 sm:$0xff]  ;;  %v483_v15 = vld [vmem:[%s717_s20 + $0x5] ss:$0 sm:$0xff] }
  0x30   : > { %v283_v12 = vadd.f32 %v481_v9, %v203_v8  ;;  %v284_v16 = vadd.f32 %v482_v13, %v204_v11  ;;  %v285_v18 = vadd.f32 %v483_v15, %v205_v14  ;;  %v484_v19 = vld [vmem:[%s717_s20 + $0x6] ss:$0 sm:$0xff]  ;;  %v485_v21 = vld [vmem:[%s717_s20 + $0x7] ss:$0 sm:$0xff]  ;;  %v486_v24 = vld [vmem:[%s717_s20 + $0x8] ss:$0 sm:$0xff] }
  0x31   : > { %297 = vst.msk [vmem:[%s719_s13] sm:$0x3] %vm296_vm0, %v280_v4  ;;  %v286_v23 = vadd.f32 %v484_v19, %v206_v17  ;;  %v287_v25 = vadd.f32 %v485_v21, %v207_v20  ;;  %v487_v27 = vld [vmem:[%s717_s20 + $0x9] ss:$0 sm:$0xff]  ;;  %v288_v28 = vadd.f32 %v486_v24, %v208_v22  ;;  %v210_v29 = vld [vmem:[%s701_s28 + $0x14] sm:$0x3] }
  0x32   : > { %298 = vst.msk [vmem:[%s719_s13 + $0x2] sm:$0x3] %vm296_vm0, %v281_v7  ;;  %v289_v30 = vadd.f32 %v487_v27, %v209_v26  ;;  %v488_v31 = vld [vmem:[%s717_s20 + $0xa] ss:$0 sm:$0xff]  ;;  %v211_v32 = vld [vmem:[%s701_s28 + $0x16] sm:$0x3] }
  0x33   : > { %299 = vst.msk [vmem:[%s719_s13 + $0x4] sm:$0x3] %vm296_vm0, %v282_v10  ;;  %v489_v33 = vld [vmem:[%s717_s20 + $0xb] ss:$0 sm:$0xff]  ;;  %v290_v34 = vadd.f32 %v488_v31, %v210_v29  ;;  %v212_v35 = vld [vmem:[%s701_s28 + $0x18] sm:$0x3] }
  0x34   : > { %300 = vst.msk [vmem:[%s719_s13 + $0x6] sm:$0x3] %vm296_vm0, %v283_v12  ;;  %v291_v36 = vadd.f32 %v489_v33, %v211_v32  ;;  %v490_v37 = vld [vmem:[%s717_s20 + $0xc] ss:$0 sm:$0xff]  ;;  %v213_v38 = vld [vmem:[%s701_s28 + $0x1a] sm:$0x3] }
  0x35   : > { %301 = vst.msk [vmem:[%s719_s13 + $0x8] sm:$0x3] %vm296_vm0, %v284_v16  ;;  %v491_v39 = vld [vmem:[%s717_s20 + $0xd] ss:$0 sm:$0xff]  ;;  %v214_v40 = vld [vmem:[%s701_s28 + $0x1c] sm:$0x3]  ;;  %v292_v41 = vadd.f32 %v490_v37, %v212_v35 }
  0x36   : > { %302 = vst.msk [vmem:[%s719_s13 + $0xa] sm:$0x3] %vm296_vm0, %v285_v18  ;;  %v492_v42 = vld [vmem:[%s717_s20 + $0xe] ss:$0 sm:$0xff]  ;;  %v293_v43 = vadd.f32 %v491_v39, %v213_v38  ;;  %v215_v44 = vld [vmem:[%s701_s28 + $0x1e] sm:$0x3] }
  0x37   : > { %303 = vst.msk [vmem:[%s719_s13 + $0xc] sm:$0x3] %vm296_vm0, %v286_v23  ;;  %v493_v45 = vld [vmem:[%s717_s20 + $0xf] ss:$0 sm:$0xff]  ;;  %v294_v46 = vadd.f32 %v492_v42, %v214_v40  ;;  %s314_s16 = scalar_lea.sflag [#allocation4], %s697_s25  ;;  %s538_s17 = sshra.s32 %s329_s14, 4  ;;  %s539_s17 = int_to_ptr.hbm [resolvable:$true] %s538_s17 }
  0x38   : > { %304 = vst.msk [vmem:[%s719_s13 + $0xe] sm:$0x3] %vm296_vm0, %v287_v25  ;;  %v295_v47 = vadd.f32 %v493_v45, %v215_v44  ;;  %s540_s19 = scalar_lea.hbm %s539_s17, 32  ;;  %s544_s26 = scalar_lea.hbm %s822_s2, 64 }
  0x39   : > { %305 = vst.msk [vmem:[%s719_s13 + $0x10] sm:$0x3] %vm296_vm0, %v288_v28  ;;  %p541_p6 = scmp.ne.s32.totalorder %s539_s17, %s540_s19  ;;  %p545_p1 = scmp.lt.s32.totalorder %s539_s17, %s822_s2 }
  0x3a   : > { %306 = vst.msk [vmem:[%s719_s13 + $0x12] sm:$0x3] %vm296_vm0, %v289_v30  ;;  %p546_p3 = scmp.lt.s32.totalorder %s544_s26, %s540_s19 }
  0x3b   : > { %307 = vst.msk [vmem:[%s719_s13 + $0x14] sm:$0x3] %vm296_vm0, %v290_v34  ;;  %p542_p13 = pnand %p541_p6, %p661_p11 }
  0x3c   : > { %308 = vst.msk [vmem:[%s719_s13 + $0x16] sm:$0x3] %vm296_vm0, %v291_v36  ;;  %p547_p4 = por %p546_p3, %p545_p1 }
  0x3d   : > { %309 = vst.msk [vmem:[%s719_s13 + $0x18] sm:$0x3] %vm296_vm0, %v292_v41  ;;  %p543_p0 = pneg %p542_p13 }
  0x3e   : > { %310 = vst.msk [vmem:[%s719_s13 + $0x1a] sm:$0x3] %vm296_vm0, %v293_v43 }
  0x3f   : > { %311 = vst.msk [vmem:[%s719_s13 + $0x1c] sm:$0x3] %vm296_vm0, %v294_v46  ;;  %p548_p7 = pnand %p547_p4, %p543_p0 }
  0x40   : > { %312 = vst.msk [vmem:[%s719_s13 + $0x1e] sm:$0x3] %vm296_vm0, %v295_v47 }
  0x41   : > { %551 = shalt.err (!%p548_p7)
}
  0x42   : > { %s594_s25 = smov 32   ;;  %s595_s29 = smov 2  }
  0x43   : > { %430 = dma.vmem_to_hbm [thread:$0]  (%p661_p11), %s327_s8, 512, %s329_s14, %s314_s16, %s594_s25, %s594_s25, %s595_s29  }
  0x44 PF: > { %s343_s30 = sand.u32 1, %s578_s9   ;;  %p828_p5 = scmp.ge.s32.totalorder %s590_s12, 2 }
  0x45   : > { %s344_s3 = scalar_lea.sflag [#allocation4], %s343_s30 }
  0x46   : > { %p437_p8 = pnand %p828_p5, %p665_p12 }
  0x48   : > { %p438_p10 = pneg %p437_p8 }
  0x4a   : > { %573 = dma.done.wait (%p438_p10), %s344_s3, 512  }
  0x4b   : > { %575 = vsyncadd (%p438_p10), %s344_s3, 4294966784  ;;  %p15_p2 = scmp.ge.s32.totalorder %s636_s15, 4   ;;  %s829_s9 = smov %s582_s10 }
  0x4c   : > { %s830_s10 = smov %s586_s11  ;;  %s831_s11 = smov %s648_s18 }
  0x4d   : > { %s832_s12 = smov %s636_s15  ;;  %17 = sbr.rel (!%p15_p2) target bundleno = 5 (0x5), region = 76 }
  0x52   :  { %350 = vsyncpa [#allocation3], 1 }
  0x53   :  { %352 = vsyncpa [#allocation3 + $0x1], 1 }
  0x54   :  { %353 = vsyncpa [#allocation4], 1 }
  0x55   :  { %355 = vsyncpa [#allocation4 + $0x1], 1 }

</bundles_post_ra>
